<compile_context>
chip_gen: v5e
topology: v5e:2x2
jax: 0.10.0
libtpu: 0.0.40
codegen_flags: <defaults>
</compile_context>

<pallas_src>
import functools

import jax
import jax.numpy as jnp
from jax.experimental import pallas as pl
from jax.experimental.pallas import tpu as pltpu


# ----------------------------------------------------------------------------
# Fused rollout kernel: per grid step = one full decoder step
#   (num_layers LSTM cells + Linear head). Weights stay resident in VMEM.
# ----------------------------------------------------------------------------
def _decoder_rollout_kernel(*refs, num_layers, hidden_size):
    """refs = (x_seq, h0, c0,
               w_ih_t_0..L-1, w_hh_t_0..L-1, bias_0..L-1, w_lin, b_lin,
               pred_out, h_out, c_out)"""
    L, H = num_layers, hidden_size
    idx = 0
    x_ref = refs[idx]; idx += 1          # (1, B, in_dim)   block for this step
    h0_ref = refs[idx]; idx += 1         # (L, B, H)
    c0_ref = refs[idx]; idx += 1         # (L, B, H)
    w_ih_refs = refs[idx:idx + L]; idx += L   # each (in_dim, 4H)
    w_hh_refs = refs[idx:idx + L]; idx += L   # each (H, 4H)
    b_refs = refs[idx:idx + L]; idx += L      # each (1, 4H)   (b_ih + b_hh)
    w_lin_ref = refs[idx]; idx += 1      # (H, out)
    b_lin_ref = refs[idx]; idx += 1      # (1, out)
    pred_ref = refs[idx]; idx += 1       # (T, B, out)  resident across grid
    h_out_ref = refs[idx]; idx += 1      # (L, B, H)    resident across grid (state)
    c_out_ref = refs[idx]; idx += 1      # (L, B, H)    resident across grid (state)

    t = pl.program_id(0)

    # Initialise the VMEM-resident recurrent state from h0/c0 on the first step.
    @pl.when(t == 0)
    def _():
        h_out_ref[...] = h0_ref[...].astype(h_out_ref.dtype)
        c_out_ref[...] = c0_ref[...].astype(c_out_ref.dtype)

    layer_in = x_ref[0].astype(jnp.float32)              # (B, in_dim)

    # Static (unrolled) loop over stacked layers; state never leaves VMEM.
    for l in range(L):
        h_prev = h_out_ref[l].astype(jnp.float32)        # (B, H)
        c_prev = c_out_ref[l].astype(jnp.float32)        # (B, H)

        # Two accumulated matmuls (no lane-misaligned concat):
        #   gates = x @ W_ih^T + h @ W_hh^T + bias     -> (B, 4H), order [i|f|g|o]
        gates = (
            jnp.dot(layer_in, w_ih_refs[l][...], preferred_element_type=jnp.float32)
            + jnp.dot(h_prev, w_hh_refs[l][...], preferred_element_type=jnp.float32)
            + b_refs[l][...]
        )

        i_g = jax.nn.sigmoid(gates[:, 0 * H:1 * H])
        f_g = jax.nn.sigmoid(gates[:, 1 * H:2 * H])
        g_g = jnp.tanh(gates[:, 2 * H:3 * H])
        o_g = jax.nn.sigmoid(gates[:, 3 * H:4 * H])

        c_new = f_g * c_prev + i_g * g_g
        h_new = o_g * jnp.tanh(c_new)

        h_out_ref[l] = h_new.astype(h_out_ref.dtype)
        c_out_ref[l] = c_new.astype(c_out_ref.dtype)
        layer_in = h_new                                 # feeds next layer

    # Linear head on the last layer's output (== pred[:, -1, :] in PyTorch).
    pred = (
        jnp.dot(layer_in, w_lin_ref[...], preferred_element_type=jnp.float32)
        + b_lin_ref[...]
    )
    pred_ref[t] = pred.astype(pred_ref.dtype)


# ----------------------------------------------------------------------------
# Wrappers
# ----------------------------------------------------------------------------
def _const_spec(shape):
    n = len(shape)
    return pl.BlockSpec(shape, lambda t: (0,) * n)   # same block every step


def decoder_rollout(params, x_seq, h0, c0):
    """Run T decoder steps in ONE pallas_call (teacher-forced step inputs).

    x_seq: (T, B, input_size); h0, c0: (num_layers, B, H)
    returns (preds (T, B, output_size), h_T, c_T)
    """
    T, B, input_size = x_seq.shape
    num_layers, _, H = h0.shape
    output_size = params["linear"]["w_t"].shape[-1]

    # Pad batch to a full sublane (multiple of 8) so vreg/MXU rows are used.
    B_pad = max(8, ((B + 7) // 8) * 8)
    if B_pad != B:
        pad = ((0, 0), (0, B_pad - B), (0, 0))
        x_seq = jnp.pad(x_seq, pad)
        h0 = jnp.pad(h0, pad)
        c0 = jnp.pad(c0, pad)

    w_ih = [p["w_ih_t"] for p in params["lstm"]]
    w_hh = [p["w_hh_t"] for p in params["lstm"]]
    biases = [p["bias"] for p in params["lstm"]]

    kernel = functools.partial(_decoder_rollout_kernel,
                               num_layers=num_layers, hidden_size=H)

    in_arrays = [x_seq, h0, c0, *w_ih, *w_hh, *biases,
                 params["linear"]["w_t"], params["linear"]["b"]]

    # Only the per-step input block changes with the grid index; everything else
    # (h0/c0 and all weights) is fetched once and stays resident in VMEM.
    in_specs = [pl.BlockSpec((1, B_pad, input_size), lambda t: (t, 0, 0))]
    in_specs += [_const_spec(a.shape) for a in in_arrays[1:]]

    out_specs = [
        pl.BlockSpec((T, B_pad, output_size), lambda t: (0, 0, 0)),
        pl.BlockSpec((num_layers, B_pad, H), lambda t: (0, 0, 0)),
        pl.BlockSpec((num_layers, B_pad, H), lambda t: (0, 0, 0)),
    ]
    out_shape = [
        jax.ShapeDtypeStruct((T, B_pad, output_size), jnp.float32),
        jax.ShapeDtypeStruct((num_layers, B_pad, H), jnp.float32),
        jax.ShapeDtypeStruct((num_layers, B_pad, H), jnp.float32),
    ]

    preds, h_new, c_new = pl.pallas_call(
        kernel,
        grid=(T,),
        in_specs=in_specs,
        out_specs=out_specs,
        out_shape=out_shape,
        compiler_params=pltpu.CompilerParams(
            dimension_semantics=("arbitrary",)),   # time steps are sequential
    )(*in_arrays)

    return preds[:, :B, :], h_new[:, :B, :], c_new[:, :B, :]


def decoder_forward(params, input_seq, h, c):
    """Exact equivalent of PyTorch Decoder.forward(input_seq, h, c) (one step)."""
    preds, h_new, c_new = decoder_rollout(params, input_seq[None], h, c)
    return preds[0], h_new, c_new


# ----------------------------------------------------------------------------
# Parameters (mirrors nn.LSTM / nn.Linear init; stored transposed for the kernel)
# ----------------------------------------------------------------------------
def init_decoder_params(key, input_size, hidden_size, num_layers, output_size):
    params = {"lstm": [], "linear": {}}
    k = 1.0 / jnp.sqrt(hidden_size)
    for layer in range(num_layers):
        in_dim = input_size if layer == 0 else hidden_size
        key, k1, k2, k3, k4 = jax.random.split(key, 5)
        w_ih = jax.random.uniform(k1, (4 * hidden_size, in_dim),
                                  minval=-k, maxval=k, dtype=jnp.float32)
        w_hh = jax.random.uniform(k2, (4 * hidden_size, hidden_size),
                                  minval=-k, maxval=k, dtype=jnp.float32)
        b_ih = jax.random.uniform(k3, (4 * hidden_size,),
                                  minval=-k, maxval=k, dtype=jnp.float32)
        b_hh = jax.random.uniform(k4, (4 * hidden_size,),
                                  minval=-k, maxval=k, dtype=jnp.float32)
        params["lstm"].append({
            "w_ih_t": w_ih.T,                 # (in_dim, 4H)
            "w_hh_t": w_hh.T,                 # (H, 4H)
            "bias": (b_ih + b_hh)[None, :],   # (1, 4H)
        })
    key, k5, k6 = jax.random.split(key, 3)
    w_lin = jax.random.uniform(k5, (output_size, hidden_size),
                               minval=-k, maxval=k, dtype=jnp.float32)
    b_lin = jax.random.uniform(k6, (output_size,),
                               minval=-k, maxval=k, dtype=jnp.float32)
    params["linear"]["w_t"] = w_lin.T          # (H, out)
    params["linear"]["b"] = b_lin[None, :]     # (1, out)
    return params


# ----------------------------------------------------------------------------
# Pure-JAX reference
# ----------------------------------------------------------------------------
def _dot(a, b):
    return jnp.dot(a, b, precision=jax.lax.Precision.HIGHEST)


def decoder_step_ref(params, x, h, c):
    H = h.shape[-1]
    h_out, c_out = [], []
    layer_in = x
    for l, p in enumerate(params["lstm"]):
        gates = _dot(layer_in, p["w_ih_t"]) + _dot(h[l], p["w_hh_t"]) + p["bias"]
        i = jax.nn.sigmoid(gates[:, 0 * H:1 * H])
        f = jax.nn.sigmoid(gates[:, 1 * H:2 * H])
        g = jnp.tanh(gates[:, 2 * H:3 * H])
        o = jax.nn.sigmoid(gates[:, 3 * H:4 * H])
        c_new = f * c[l] + i * g
        h_new = o * jnp.tanh(c_new)
        h_out.append(h_new)
        c_out.append(c_new)
        layer_in = h_new
    pred = _dot(layer_in, params["linear"]["w_t"]) + params["linear"]["b"]
    return pred, jnp.stack(h_out, 0), jnp.stack(c_out, 0)


def decoder_rollout_ref(params, x_seq, h, c):
    preds = []
    for t in range(x_seq.shape[0]):
        pred, h, c = decoder_step_ref(params, x_seq[t], h, c)
        preds.append(pred)
    return jnp.stack(preds, 0), h, c


# ----------------------------------------------------------------------------
# Main
# ----------------------------------------------------------------------------
if __name__ == "__main__":
    batch = 2
    input_size = 4
    hidden_size = 32
    num_layers = 2
    output_size = 4
    T = 8

    key = jax.random.PRNGKey(0)
    key, k_p, k_x, k_h, k_c = jax.random.split(key, 5)

    params = init_decoder_params(k_p, input_size, hidden_size, num_layers, output_size)

    x_seq = jax.random.normal(k_x, (T, batch, input_size), dtype=jnp.float32)
    h0 = jax.random.normal(k_h, (num_layers, batch, hidden_size), dtype=jnp.float32)
    c0 = jax.random.normal(k_c, (num_layers, batch, hidden_size), dtype=jnp.float32)

    # Single-step call == PyTorch Decoder.forward.
    pred1, h1, c1 = decoder_forward(params, x_seq[0], h0, c0)
    # Multi-step rollout: time loop inside the kernel, weights DMA'd once.
    pred_seq, hT, cT = decoder_rollout(params, x_seq, h0, c0)
    jax.block_until_ready((pred1, h1, c1, pred_seq, hT, cT))

    # Check against pure-JAX reference.
    pred1_r, h1_r, c1_r = decoder_step_ref(params, x_seq[0], h0, c0)
    pred_seq_r, hT_r, cT_r = decoder_rollout_ref(params, x_seq, h0, c0)

    assert jnp.allclose(pred1, pred1_r, atol=1e-4), "single-step pred mismatch"
    assert jnp.allclose(h1, h1_r, atol=1e-4), "single-step h mismatch"
    assert jnp.allclose(c1, c1_r, atol=1e-4), "single-step c mismatch"
    assert jnp.allclose(pred_seq, pred_seq_r, atol=1e-4), "rollout pred mismatch"
    assert jnp.allclose(hT, hT_r, atol=1e-4), "rollout h mismatch"
    assert jnp.allclose(cT, cT_r, atol=1e-4), "rollout c mismatch"

    print("KERNEL_OK")
</pallas_src>

<mosaic_0001>
module attributes {stable_mosaic.version = 11 : i64} {
  func.func @_decoder_rollout_kernel(%arg0: i32, %arg1: memref<1x8x4xf32, #tpu.memory_space<vmem>>, %arg2: memref<2x8x32xf32, #tpu.memory_space<vmem>>, %arg3: memref<2x8x32xf32, #tpu.memory_space<vmem>>, %arg4: memref<4x128xf32, #tpu.memory_space<vmem>>, %arg5: memref<32x128xf32, #tpu.memory_space<vmem>>, %arg6: memref<32x128xf32, #tpu.memory_space<vmem>>, %arg7: memref<32x128xf32, #tpu.memory_space<vmem>>, %arg8: memref<1x128xf32, #tpu.memory_space<vmem>>, %arg9: memref<1x128xf32, #tpu.memory_space<vmem>>, %arg10: memref<32x4xf32, #tpu.memory_space<vmem>>, %arg11: memref<1x4xf32, #tpu.memory_space<vmem>>, %arg12: memref<1x8x4xf32, #tpu.memory_space<vmem>>, %arg13: memref<2x8x32xf32, #tpu.memory_space<vmem>>, %arg14: memref<2x8x32xf32, #tpu.memory_space<vmem>>) attributes {dimension_semantics = [#tpu.dimension_semantics<arbitrary>], iteration_bounds = array<i64: 1>, scalar_prefetch = 0 : i64, scratch_operands = 0 : i64, tpu.core_type = #tpu.core_type<tc>, window_params = [{transform_indices = @transform_0, window_bounds = array<i64: 1, 8, 4>}, {pipeline_mode = #tpu.pipeline_mode<synchronous>, transform_indices = @transform_1, window_bounds = array<i64: 2, 8, 32>}, {pipeline_mode = #tpu.pipeline_mode<synchronous>, transform_indices = @transform_2, window_bounds = array<i64: 2, 8, 32>}, {pipeline_mode = #tpu.pipeline_mode<synchronous>, transform_indices = @transform_3, window_bounds = array<i64: 4, 128>}, {pipeline_mode = #tpu.pipeline_mode<synchronous>, transform_indices = @transform_4, window_bounds = array<i64: 32, 128>}, {pipeline_mode = #tpu.pipeline_mode<synchronous>, transform_indices = @transform_5, window_bounds = array<i64: 32, 128>}, {pipeline_mode = #tpu.pipeline_mode<synchronous>, transform_indices = @transform_6, window_bounds = array<i64: 32, 128>}, {pipeline_mode = #tpu.pipeline_mode<synchronous>, transform_indices = @transform_7, window_bounds = array<i64: 1, 128>}, {pipeline_mode = #tpu.pipeline_mode<synchronous>, transform_indices = @transform_8, window_bounds = array<i64: 1, 128>}, {pipeline_mode = #tpu.pipeline_mode<synchronous>, transform_indices = @transform_9, window_bounds = array<i64: 32, 4>}, {pipeline_mode = #tpu.pipeline_mode<synchronous>, transform_indices = @transform_10, window_bounds = array<i64: 1, 4>}, {pipeline_mode = #tpu.pipeline_mode<synchronous>, transform_indices = @transform_11, window_bounds = array<i64: 1, 8, 4>}, {pipeline_mode = #tpu.pipeline_mode<synchronous>, transform_indices = @transform_12, window_bounds = array<i64: 2, 8, 32>}, {pipeline_mode = #tpu.pipeline_mode<synchronous>, transform_indices = @transform_13, window_bounds = array<i64: 2, 8, 32>}]} {
    %c0_i32 = arith.constant 0 : i32
    %0 = arith.cmpi eq, %arg0, %c0_i32 : i32
    %1 = arith.extui %0 : i1 to i32
    %c0_i32_0 = arith.constant 0 : i32
    %2 = arith.cmpi ne, %1, %c0_i32_0 : i32
    scf.if %2 {
      %c0_54 = arith.constant 0 : index
      %c0_55 = arith.constant 0 : index
      %c0_56 = arith.constant 0 : index
      %100 = vector.load %arg2[%c0_54, %c0_55, %c0_56] : memref<2x8x32xf32, #tpu.memory_space<vmem>>, vector<2x8x32xf32>
      %c0_57 = arith.constant 0 : index
      %c0_58 = arith.constant 0 : index
      %c0_59 = arith.constant 0 : index
      %101 = vector.load %arg13[%c0_57, %c0_58, %c0_59] : memref<2x8x32xf32, #tpu.memory_space<vmem>>, vector<2x8x32xf32>
      tpu.vector_store %arg13[%c0_57, %c0_58, %c0_59], %100 {strides = array<i32>} : memref<2x8x32xf32, #tpu.memory_space<vmem>>, vector<2x8x32xf32>,
      %c0_60 = arith.constant 0 : index
      %c0_61 = arith.constant 0 : index
      %c0_62 = arith.constant 0 : index
      %102 = vector.load %arg3[%c0_60, %c0_61, %c0_62] : memref<2x8x32xf32, #tpu.memory_space<vmem>>, vector<2x8x32xf32>
      %c0_63 = arith.constant 0 : index
      %c0_64 = arith.constant 0 : index
      %c0_65 = arith.constant 0 : index
      %103 = vector.load %arg14[%c0_63, %c0_64, %c0_65] : memref<2x8x32xf32, #tpu.memory_space<vmem>>, vector<2x8x32xf32>
      tpu.vector_store %arg14[%c0_63, %c0_64, %c0_65], %102 {strides = array<i32>} : memref<2x8x32xf32, #tpu.memory_space<vmem>>, vector<2x8x32xf32>,
    } else {
    }
    %c0 = arith.constant 0 : index
    %c0_1 = arith.constant 0 : index
    %c0_2 = arith.constant 0 : index
    %3 = vector.load %arg1[%c0, %c0_1, %c0_2] : memref<1x8x4xf32, #tpu.memory_space<vmem>>, vector<1x8x4xf32>
    %4 = vector.shape_cast %3 : vector<1x8x4xf32> to vector<8x4xf32>
    %c0_3 = arith.constant 0 : index
    %c0_4 = arith.constant 0 : index
    %c0_5 = arith.constant 0 : index
    %5 = vector.load %arg13[%c0_3, %c0_4, %c0_5] : memref<2x8x32xf32, #tpu.memory_space<vmem>>, vector<1x8x32xf32>
    %6 = vector.shape_cast %5 : vector<1x8x32xf32> to vector<8x32xf32>
    %c0_6 = arith.constant 0 : index
    %c0_7 = arith.constant 0 : index
    %c0_8 = arith.constant 0 : index
    %7 = vector.load %arg14[%c0_6, %c0_7, %c0_8] : memref<2x8x32xf32, #tpu.memory_space<vmem>>, vector<1x8x32xf32>
    %8 = vector.shape_cast %7 : vector<1x8x32xf32> to vector<8x32xf32>
    %c0_9 = arith.constant 0 : index
    %c0_10 = arith.constant 0 : index
    %9 = vector.load %arg4[%c0_9, %c0_10] : memref<4x128xf32, #tpu.memory_space<vmem>>, vector<4x128xf32>
    %cst = arith.constant dense<0.000000e+00> : vector<8x128xf32>
    %10 = tpu.matmul %4, %9, %cst {dimension_numbers = #tpu.dot_dimension_numbers<[1], [0], [0], [1], [0, 0, 1, 1], [], []>} : vector<8x4xf32>, vector<4x128xf32>, vector<8x128xf32> -> vector<8x128xf32>
    %c0_11 = arith.constant 0 : index
    %c0_12 = arith.constant 0 : index
    %11 = vector.load %arg6[%c0_11, %c0_12] : memref<32x128xf32, #tpu.memory_space<vmem>>, vector<32x128xf32>
    %cst_13 = arith.constant dense<0.000000e+00> : vector<8x128xf32>
    %12 = tpu.matmul %6, %11, %cst_13 {dimension_numbers = #tpu.dot_dimension_numbers<[1], [0], [0], [1], [0, 0, 1, 1], [], []>} : vector<8x32xf32>, vector<32x128xf32>, vector<8x128xf32> -> vector<8x128xf32>
    %13 = arith.addf %10, %12 : vector<8x128xf32>
    %c0_14 = arith.constant 0 : index
    %c0_15 = arith.constant 0 : index
    %14 = vector.load %arg8[%c0_14, %c0_15] : memref<1x128xf32, #tpu.memory_space<vmem>>, vector<1x128xf32>
    %15 = vector.broadcast %14 : vector<1x128xf32> to vector<8x128xf32>
    %16 = arith.addf %13, %15 : vector<8x128xf32>
    %17 = vector.extract_strided_slice %16 {offsets = [0, 0], sizes = [8, 32], strides = [1, 1]} : vector<8x128xf32> to vector<8x32xf32>
    %18 = arith.negf %17 : vector<8x32xf32>
    %19 = math.exp %18 : vector<8x32xf32>
    %cst_16 = arith.constant 1.000000e+00 : f32
    %20 = vector.broadcast %cst_16 : f32 to vector<8x32xf32>
    %21 = arith.addf %20, %19 : vector<8x32xf32>
    %22 = arith.divf %20, %21 : vector<8x32xf32>
    %23 = vector.extract_strided_slice %16 {offsets = [0, 32], sizes = [8, 32], strides = [1, 1]} : vector<8x128xf32> to vector<8x32xf32>
    %24 = arith.negf %23 : vector<8x32xf32>
    %25 = math.exp %24 : vector<8x32xf32>
    %cst_17 = arith.constant 1.000000e+00 : f32
    %26 = vector.broadcast %cst_17 : f32 to vector<8x32xf32>
    %27 = arith.addf %26, %25 : vector<8x32xf32>
    %28 = arith.divf %26, %27 : vector<8x32xf32>
    %29 = vector.extract_strided_slice %16 {offsets = [0, 64], sizes = [8, 32], strides = [1, 1]} : vector<8x128xf32> to vector<8x32xf32>
    %30 = math.tanh %29 : vector<8x32xf32>
    %31 = vector.extract_strided_slice %16 {offsets = [0, 96], sizes = [8, 32], strides = [1, 1]} : vector<8x128xf32> to vector<8x32xf32>
    %32 = arith.negf %31 : vector<8x32xf32>
    %33 = math.exp %32 : vector<8x32xf32>
    %cst_18 = arith.constant 1.000000e+00 : f32
    %34 = vector.broadcast %cst_18 : f32 to vector<8x32xf32>
    %35 = arith.addf %34, %33 : vector<8x32xf32>
    %36 = arith.divf %34, %35 : vector<8x32xf32>
    %37 = arith.mulf %28, %8 : vector<8x32xf32>
    %38 = arith.mulf %22, %30 : vector<8x32xf32>
    %39 = arith.addf %37, %38 : vector<8x32xf32>
    %40 = math.tanh %39 : vector<8x32xf32>
    %41 = arith.mulf %36, %40 : vector<8x32xf32>
    %c0_19 = arith.constant 0 : index
    %c0_20 = arith.constant 0 : index
    %c0_21 = arith.constant 0 : index
    %42 = vector.load %arg13[%c0_19, %c0_20, %c0_21] : memref<2x8x32xf32, #tpu.memory_space<vmem>>, vector<1x8x32xf32>
    %43 = vector.shape_cast %42 : vector<1x8x32xf32> to vector<8x32xf32>
    %44 = vector.shape_cast %41 : vector<8x32xf32> to vector<1x8x32xf32>
    tpu.vector_store %arg13[%c0_19, %c0_20, %c0_21], %44 {strides = array<i32>} : memref<2x8x32xf32, #tpu.memory_space<vmem>>, vector<1x8x32xf32>,
    %c0_22 = arith.constant 0 : index
    %c0_23 = arith.constant 0 : index
    %c0_24 = arith.constant 0 : index
    %45 = vector.load %arg14[%c0_22, %c0_23, %c0_24] : memref<2x8x32xf32, #tpu.memory_space<vmem>>, vector<1x8x32xf32>
    %46 = vector.shape_cast %45 : vector<1x8x32xf32> to vector<8x32xf32>
    %47 = vector.shape_cast %39 : vector<8x32xf32> to vector<1x8x32xf32>
    tpu.vector_store %arg14[%c0_22, %c0_23, %c0_24], %47 {strides = array<i32>} : memref<2x8x32xf32, #tpu.memory_space<vmem>>, vector<1x8x32xf32>,
    %c1 = arith.constant 1 : index
    %c0_25 = arith.constant 0 : index
    %c0_26 = arith.constant 0 : index
    %48 = vector.load %arg13[%c1, %c0_25, %c0_26] : memref<2x8x32xf32, #tpu.memory_space<vmem>>, vector<1x8x32xf32>
    %49 = vector.shape_cast %48 : vector<1x8x32xf32> to vector<8x32xf32>
    %c1_27 = arith.constant 1 : index
    %c0_28 = arith.constant 0 : index
    %c0_29 = arith.constant 0 : index
    %50 = vector.load %arg14[%c1_27, %c0_28, %c0_29] : memref<2x8x32xf32, #tpu.memory_space<vmem>>, vector<1x8x32xf32>
    %51 = vector.shape_cast %50 : vector<1x8x32xf32> to vector<8x32xf32>
    %c0_30 = arith.constant 0 : index
    %c0_31 = arith.constant 0 : index
    %52 = vector.load %arg5[%c0_30, %c0_31] : memref<32x128xf32, #tpu.memory_space<vmem>>, vector<32x128xf32>
    %cst_32 = arith.constant dense<0.000000e+00> : vector<8x128xf32>
    %53 = tpu.matmul %41, %52, %cst_32 {dimension_numbers = #tpu.dot_dimension_numbers<[1], [0], [0], [1], [0, 0, 1, 1], [], []>} : vector<8x32xf32>, vector<32x128xf32>, vector<8x128xf32> -> vector<8x128xf32>
    %c0_33 = arith.constant 0 : index
    %c0_34 = arith.constant 0 : index
    %54 = vector.load %arg7[%c0_33, %c0_34] : memref<32x128xf32, #tpu.memory_space<vmem>>, vector<32x128xf32>
    %cst_35 = arith.constant dense<0.000000e+00> : vector<8x128xf32>
    %55 = tpu.matmul %49, %54, %cst_35 {dimension_numbers = #tpu.dot_dimension_numbers<[1], [0], [0], [1], [0, 0, 1, 1], [], []>} : vector<8x32xf32>, vector<32x128xf32>, vector<8x128xf32> -> vector<8x128xf32>
    %56 = arith.addf %53, %55 : vector<8x128xf32>
    %c0_36 = arith.constant 0 : index
    %c0_37 = arith.constant 0 : index
    %57 = vector.load %arg9[%c0_36, %c0_37] : memref<1x128xf32, #tpu.memory_space<vmem>>, vector<1x128xf32>
    %58 = vector.broadcast %57 : vector<1x128xf32> to vector<8x128xf32>
    %59 = arith.addf %56, %58 : vector<8x128xf32>
    %60 = vector.extract_strided_slice %59 {offsets = [0, 0], sizes = [8, 32], strides = [1, 1]} : vector<8x128xf32> to vector<8x32xf32>
    %61 = arith.negf %60 : vector<8x32xf32>
    %62 = math.exp %61 : vector<8x32xf32>
    %cst_38 = arith.constant 1.000000e+00 : f32
    %63 = vector.broadcast %cst_38 : f32 to vector<8x32xf32>
    %64 = arith.addf %63, %62 : vector<8x32xf32>
    %65 = arith.divf %63, %64 : vector<8x32xf32>
    %66 = vector.extract_strided_slice %59 {offsets = [0, 32], sizes = [8, 32], strides = [1, 1]} : vector<8x128xf32> to vector<8x32xf32>
    %67 = arith.negf %66 : vector<8x32xf32>
    %68 = math.exp %67 : vector<8x32xf32>
    %cst_39 = arith.constant 1.000000e+00 : f32
    %69 = vector.broadcast %cst_39 : f32 to vector<8x32xf32>
    %70 = arith.addf %69, %68 : vector<8x32xf32>
    %71 = arith.divf %69, %70 : vector<8x32xf32>
    %72 = vector.extract_strided_slice %59 {offsets = [0, 64], sizes = [8, 32], strides = [1, 1]} : vector<8x128xf32> to vector<8x32xf32>
    %73 = math.tanh %72 : vector<8x32xf32>
    %74 = vector.extract_strided_slice %59 {offsets = [0, 96], sizes = [8, 32], strides = [1, 1]} : vector<8x128xf32> to vector<8x32xf32>
    %75 = arith.negf %74 : vector<8x32xf32>
    %76 = math.exp %75 : vector<8x32xf32>
    %cst_40 = arith.constant 1.000000e+00 : f32
    %77 = vector.broadcast %cst_40 : f32 to vector<8x32xf32>
    %78 = arith.addf %77, %76 : vector<8x32xf32>
    %79 = arith.divf %77, %78 : vector<8x32xf32>
    %80 = arith.mulf %71, %51 : vector<8x32xf32>
    %81 = arith.mulf %65, %73 : vector<8x32xf32>
    %82 = arith.addf %80, %81 : vector<8x32xf32>
    %83 = math.tanh %82 : vector<8x32xf32>
    %84 = arith.mulf %79, %83 : vector<8x32xf32>
    %c1_41 = arith.constant 1 : index
    %c0_42 = arith.constant 0 : index
    %c0_43 = arith.constant 0 : index
    %85 = vector.load %arg13[%c1_41, %c0_42, %c0_43] : memref<2x8x32xf32, #tpu.memory_space<vmem>>, vector<1x8x32xf32>
    %86 = vector.shape_cast %85 : vector<1x8x32xf32> to vector<8x32xf32>
    %87 = vector.shape_cast %84 : vector<8x32xf32> to vector<1x8x32xf32>
    tpu.vector_store %arg13[%c1_41, %c0_42, %c0_43], %87 {strides = array<i32>} : memref<2x8x32xf32, #tpu.memory_space<vmem>>, vector<1x8x32xf32>,
    %c1_44 = arith.constant 1 : index
    %c0_45 = arith.constant 0 : index
    %c0_46 = arith.constant 0 : index
    %88 = vector.load %arg14[%c1_44, %c0_45, %c0_46] : memref<2x8x32xf32, #tpu.memory_space<vmem>>, vector<1x8x32xf32>
    %89 = vector.shape_cast %88 : vector<1x8x32xf32> to vector<8x32xf32>
    %90 = vector.shape_cast %82 : vector<8x32xf32> to vector<1x8x32xf32>
    tpu.vector_store %arg14[%c1_44, %c0_45, %c0_46], %90 {strides = array<i32>} : memref<2x8x32xf32, #tpu.memory_space<vmem>>, vector<1x8x32xf32>,
    %c0_47 = arith.constant 0 : index
    %c0_48 = arith.constant 0 : index
    %91 = vector.load %arg10[%c0_47, %c0_48] : memref<32x4xf32, #tpu.memory_space<vmem>>, vector<32x4xf32>
    %cst_49 = arith.constant dense<0.000000e+00> : vector<8x4xf32>
    %92 = tpu.matmul %84, %91, %cst_49 {dimension_numbers = #tpu.dot_dimension_numbers<[1], [0], [0], [1], [0, 0, 1, 1], [], []>} : vector<8x32xf32>, vector<32x4xf32>, vector<8x4xf32> -> vector<8x4xf32>
    %c0_50 = arith.constant 0 : index
    %c0_51 = arith.constant 0 : index
    %93 = vector.load %arg11[%c0_50, %c0_51] : memref<1x4xf32, #tpu.memory_space<vmem>>, vector<1x4xf32>
    %94 = vector.broadcast %93 : vector<1x4xf32> to vector<8x4xf32>
    %95 = arith.addf %92, %94 : vector<8x4xf32>
    %96 = arith.index_cast %arg0 : i32 to index
    %c0_52 = arith.constant 0 : index
    %c0_53 = arith.constant 0 : index
    %97 = vector.load %arg12[%96, %c0_52, %c0_53] : memref<1x8x4xf32, #tpu.memory_space<vmem>>, vector<1x8x4xf32>
    %98 = vector.shape_cast %97 : vector<1x8x4xf32> to vector<8x4xf32>
    %99 = vector.shape_cast %95 : vector<8x4xf32> to vector<1x8x4xf32>
    tpu.vector_store %arg12[%96, %c0_52, %c0_53], %99 {strides = array<i32>} : memref<1x8x4xf32, #tpu.memory_space<vmem>>, vector<1x8x4xf32>,
    return
  }
  func.func @transform_0(%arg0: i32) -> (i32, i32, i32) {
    %c0_i32 = arith.constant 0 : i32
    %c0_i32_0 = arith.constant 0 : i32
    %c0_i32_1 = arith.constant 0 : i32
    return %arg0, %c0_i32, %c0_i32_0 : i32, i32, i32
  }
  func.func @transform_1(%arg0: i32) -> (i32, i32, i32) {
    %c0_i32 = arith.constant 0 : i32
    %c0_i32_0 = arith.constant 0 : i32
    %c0_i32_1 = arith.constant 0 : i32
    %c0_i32_2 = arith.constant 0 : i32
    return %c0_i32, %c0_i32_0, %c0_i32_1 : i32, i32, i32
  }
  func.func @transform_2(%arg0: i32) -> (i32, i32, i32) {
    %c0_i32 = arith.constant 0 : i32
    %c0_i32_0 = arith.constant 0 : i32
    %c0_i32_1 = arith.constant 0 : i32
    %c0_i32_2 = arith.constant 0 : i32
    return %c0_i32, %c0_i32_0, %c0_i32_1 : i32, i32, i32
  }
  func.func @transform_3(%arg0: i32) -> (i32, i32) {
    %c0_i32 = arith.constant 0 : i32
    %c0_i32_0 = arith.constant 0 : i32
    %c0_i32_1 = arith.constant 0 : i32
    return %c0_i32, %c0_i32_0 : i32, i32
  }
  func.func @transform_4(%arg0: i32) -> (i32, i32) {
    %c0_i32 = arith.constant 0 : i32
    %c0_i32_0 = arith.constant 0 : i32
    %c0_i32_1 = arith.constant 0 : i32
    return %c0_i32, %c0_i32_0 : i32, i32
  }
  func.func @transform_5(%arg0: i32) -> (i32, i32) {
    %c0_i32 = arith.constant 0 : i32
    %c0_i32_0 = arith.constant 0 : i32
    %c0_i32_1 = arith.constant 0 : i32
    return %c0_i32, %c0_i32_0 : i32, i32
  }
  func.func @transform_6(%arg0: i32) -> (i32, i32) {
    %c0_i32 = arith.constant 0 : i32
    %c0_i32_0 = arith.constant 0 : i32
    %c0_i32_1 = arith.constant 0 : i32
    return %c0_i32, %c0_i32_0 : i32, i32
  }
  func.func @transform_7(%arg0: i32) -> (i32, i32) {
    %c0_i32 = arith.constant 0 : i32
    %c0_i32_0 = arith.constant 0 : i32
    %c0_i32_1 = arith.constant 0 : i32
    return %c0_i32, %c0_i32_0 : i32, i32
  }
  func.func @transform_8(%arg0: i32) -> (i32, i32) {
    %c0_i32 = arith.constant 0 : i32
    %c0_i32_0 = arith.constant 0 : i32
    %c0_i32_1 = arith.constant 0 : i32
    return %c0_i32, %c0_i32_0 : i32, i32
  }
  func.func @transform_9(%arg0: i32) -> (i32, i32) {
    %c0_i32 = arith.constant 0 : i32
    %c0_i32_0 = arith.constant 0 : i32
    %c0_i32_1 = arith.constant 0 : i32
    return %c0_i32, %c0_i32_0 : i32, i32
  }
  func.func @transform_10(%arg0: i32) -> (i32, i32) {
    %c0_i32 = arith.constant 0 : i32
    %c0_i32_0 = arith.constant 0 : i32
    %c0_i32_1 = arith.constant 0 : i32
    return %c0_i32, %c0_i32_0 : i32, i32
  }
  func.func @transform_11(%arg0: i32) -> (i32, i32, i32) {
    %c0_i32 = arith.constant 0 : i32
    %c0_i32_0 = arith.constant 0 : i32
    %c0_i32_1 = arith.constant 0 : i32
    %c0_i32_2 = arith.constant 0 : i32
    return %c0_i32, %c0_i32_0, %c0_i32_1 : i32, i32, i32
  }
  func.func @transform_12(%arg0: i32) -> (i32, i32, i32) {
    %c0_i32 = arith.constant 0 : i32
    %c0_i32_0 = arith.constant 0 : i32
    %c0_i32_1 = arith.constant 0 : i32
    %c0_i32_2 = arith.constant 0 : i32
    return %c0_i32, %c0_i32_0, %c0_i32_1 : i32, i32, i32
  }
  func.func @transform_13(%arg0: i32) -> (i32, i32, i32) {
    %c0_i32 = arith.constant 0 : i32
    %c0_i32_0 = arith.constant 0 : i32
    %c0_i32_1 = arith.constant 0 : i32
    %c0_i32_2 = arith.constant 0 : i32
    return %c0_i32, %c0_i32_0, %c0_i32_1 : i32, i32, i32
  }
}

</mosaic_0001>

<bundles_post_ra>
// kernel: tpu_custom_call.1
= control target key start
LH: loop header
LB: loop body
LE: loop exit
PB: predicated region body
PF: predicated region fallthrough
CT: control target
= control target key end

     0   :  { %19 = vsyncpa [#allocation3], 0  ;;  %s803_s0 = inlined_call_operand.vmem [shape: f32[1,8,4], index: 0, kind: input, shape index: {}]   ;;  %s804_s1 = inlined_call_operand.hbm [shape: f32[2,8,32], index: 1, kind: input, shape index: {}]   ;;  %s805_s2 = inlined_call_operand.hbm [shape: f32[2,8,32], index: 2, kind: input, shape index: {}]   ;;  %s806_s3 = inlined_call_operand.vmem [shape: f32[4,128], index: 3, kind: input, shape index: {}]   ;;  %s807_s4 = inlined_call_operand.vmem [shape: f32[32,128], index: 4, kind: input, shape index: {}]   ;;  %s808_s5 = inlined_call_operand.hbm [shape: f32[32,128], index: 5, kind: input, shape index: {}]   ;;  %s809_s6 = inlined_call_operand.hbm [shape: f32[32,128], index: 6, kind: input, shape index: {}]   ;;  %s810_s7 = inlined_call_operand.vmem [shape: f32[1,128], index: 7, kind: input, shape index: {}]   ;;  %s811_s8 = inlined_call_operand.vmem [shape: f32[1,128], index: 8, kind: input, shape index: {}]   ;;  %s812_s9 = inlined_call_operand.vmem [shape: f32[32,4], index: 9, kind: input, shape index: {}]   ;;  %s813_s10 = inlined_call_operand.vmem [shape: f32[1,4], index: 10, kind: input, shape index: {}]   ;;  %s814_s11 = inlined_call_operand.vmem [shape: f32[1,8,4], index: 11, kind: output, shape index: {0}]   ;;  %s815_s12 = inlined_call_operand.hbm [shape: f32[2,8,32], index: 12, kind: output, shape index: {1}]   ;;  %s816_s13 = inlined_call_operand.hbm [shape: f32[2,8,32], index: 13, kind: output, shape index: {2}]  }
   0x1   :  { %20 = vsyncpa [#allocation6], 0 }
   0x2   :  { %21 = vsyncpa [#allocation9], 0 }
   0x3   :  { %22 = vsyncpa [#allocation4], 0 }
   0x4   :  { %23 = vsyncpa [#allocation12], 0  ;;  %s43_s27 = sshll.u32 %s805_s2, 4  ;;  %s616_s28 = smov [#allocation5]   ;;  %s44_s27 = int_to_ptr.hbm [resolvable:$true] %s43_s27 }
   0x5   :  { %s45_s29 = sshll.u32 %s616_s28, 4  ;;  %s30_s15 = sshll.u32 %s804_s1, 4  ;;  %s46_s29 = int_to_ptr.vmem [resolvable:$true] %s45_s29  ;;  %s31_s15 = int_to_ptr.hbm [resolvable:$true] %s30_s15 }
   0x6   :  { %s617_s16 = smov 128   ;;  %s618_s17 = smov 8  }
   0x7   :  { %51 = dma.hbm_to_vmem [thread:$0]  %s44_s27, 256, %s46_s29, [#allocation6], %s617_s16, %s617_s16, %s618_s17  }
   0x8   :  { %s619_s18 = smov [#allocation2]   ;;  %s60_s2 = sshll.u32 %s808_s5, 4  ;;  %s61_s2 = int_to_ptr.hbm [resolvable:$true] %s60_s2 }
   0x9   :  { %s32_s19 = sshll.u32 %s619_s18, 4  ;;  %s73_s23 = sshll.u32 %s809_s6, 4  ;;  %s33_s19 = int_to_ptr.vmem [resolvable:$true] %s32_s19  ;;  %s74_s23 = int_to_ptr.hbm [resolvable:$true] %s73_s23 }
   0xa   :  { %38 = dma.hbm_to_vmem [thread:$0]  %s31_s15, 256, %s33_s19, [#allocation3], %s617_s16, %s617_s16, %s618_s17  }
   0xb   :  { %s620_s24 = smov [#allocation7]   ;;  %s621_s26 = smov [#allocation8]  }
   0xc   :  { %s62_s25 = sshll.u32 %s620_s24, 4  ;;  %s75_s5 = sshll.u32 %s621_s26, 4  ;;  %s63_s25 = int_to_ptr.vmem [resolvable:$true] %s62_s25  ;;  %s76_s5 = int_to_ptr.vmem [resolvable:$true] %s75_s5 }
   0xd   :  { %68 = dma.hbm_to_vmem [thread:$0]  %s61_s2, 512, %s63_s25, [#allocation6], %s617_s16, %s617_s16, %s618_s17  }
   0xe   :  { %81 = dma.hbm_to_vmem [thread:$0]  %s74_s23, 512, %s76_s5, [#allocation9], %s617_s16, %s617_s16, %s618_s17  }
   0xf   :  { %606 = dma.done.wait [#allocation3], 256  }
  0x10   :  { %607 = vsyncadd [#allocation3], 4294967040 }
  0x11   :  { %608 = dma.done.wait [#allocation6], 768  }
  0x12   :  { %609 = vsyncadd [#allocation6], 4294966528 }
  0x13   :  { %610 = dma.done.wait [#allocation9], 512  }
  0x14   :  { %611 = vsyncadd [#allocation9], 4294966784  ;;  %vm155_vm0 = vcmask 1043456   ;;  %vm112_vm1 = vcmask 261120   ;;  %v126_v0 = vld [vmem:[#allocation7 + $0x18] sm:$0xff]  ;;  %v125_v1 = vld [vmem:[#allocation7 + $0x10] sm:$0xff] }
  0x15   :  { %vm151_vm2 = vcmask 31744   ;;  %143 = vmatpush.msra.mxu0 %v126_v0  ;;  %v124_v2 = vld [vmem:[#allocation7 + $0x8] sm:$0xff]  ;;  %v122_v3 = vld [vmem:[%s806_s3] sm:$0xf]  ;;  %v115_v8 = vld [vmem:[#allocation5] sm:$0xff]  ;;  %s623_s14 = smov 32  }
  0x16   :  { %v110_v4 = vld [vmem:[#allocation2] sm:$0xff]  ;;  %425 = vmatpush.msk.msra.mxu1 %vm155_vm0, %v122_v3  ;;  %117 = vst.msk [vmem:[#allocation11] sm:$0xff] %vm112_vm1, %v115_v8  ;;  %v246_v36 = vld [vmem:[#allocation8 + $0x18] sm:$0xff]  ;;  %v245_v38 = vld [vmem:[#allocation8 + $0x10] sm:$0xff]  ;;  %s625_s29 = smov [#allocation10]   ;;  %s402_s19 = sshll.u32 %s816_s13, 4  ;;  %s403_s19 = int_to_ptr.hbm [resolvable:$true] %s402_s19 }
  0x17   :  { %113 = vst.msk [vmem:[#allocation10] sm:$0xff] %vm112_vm1, %v110_v4  ;;  %v119_v5 = vld [vmem:[%s803_s0] sm:$0xff]  ;;  %144 = vmatpush.msra.mxu0 %v125_v1  ;;  %s622_s0 = smov 64   ;;  %v242_v37 = vld [vmem:[%s807_s4 + $0x18] sm:$0xff]  ;;  %262 = vmatpush.msra.mxu2 %v246_v36  ;;  %v241_v39 = vld [vmem:[%s807_s4 + $0x10] sm:$0xff]  ;;  %s387_s3 = sshll.u32 %s625_s29, 4  ;;  %s388_s3 = int_to_ptr.vmem [resolvable:$true] %s387_s3 }
  0x18   :  { %426 = vmatmul.msk.f32.vlgmr.msra.gmra.mxu1 %vm151_vm2, %v119_v5  ;;  %v123_v6 = vld [vmem:[#allocation7] sm:$0xff]  ;;  %284 = vmatpush.msra.mxu3 %v242_v37  ;;  %v244_v40 = vld [vmem:[#allocation8 + $0x8] sm:$0xff]  ;;  %v116_v48 = vld [vmem:[#allocation5 + $0x8] sm:$0xff] }
  0x19   :  { %145 = vmatpush.msra.mxu0 %v124_v2  ;;  %v443_v10 = vld [vmem:[%s810_s7] ss:$0 sm:$0xff]  ;;  %v240_v41 = vld [vmem:[%s807_s4 + $0x8] sm:$0xff]  ;;  %263 = vmatpush.msra.mxu2 %v245_v38  ;;  %118 = vst.msk [vmem:[#allocation11 + $0x8] sm:$0xff] %vm112_vm1, %v116_v48  ;;  %s389_s7 = sshll.u32 %s815_s12, 4  ;;  %s390_s7 = int_to_ptr.hbm [resolvable:$true] %s389_s7 }
  0x1a   :  { %285 = vmatpush.msra.mxu3 %v241_v39  ;;  %v243_v42 = vld [vmem:[#allocation8] sm:$0xff]  ;;  %v111_v46 = vld [vmem:[#allocation2 + $0x8] sm:$0xff] }
  0x1b   :  { %146 = vmatpush.msra.mxu0 %v123_v6  ;;  %v239_v43 = vld [vmem:[%s807_s4] sm:$0xff]  ;;  %264 = vmatpush.msra.mxu2 %v244_v40  ;;  %114 = vst.msk [vmem:[#allocation10 + $0x8] sm:$0xff] %vm112_vm1, %v111_v46 }
  0x1c   :  { %286 = vmatpush.msra.mxu3 %v240_v41  ;;  %v444_v52 = vld [vmem:[%s811_s8] ss:$0 sm:$0xff]  ;;  %s624_s8 = smov 96  }
  0x1d   :  { %v121_v15 = vld [vmem:[#allocation11] sm:$0xff]  ;;  %265 = vmatpush.msra.mxu2 %v243_v42 }
  0x1e   :  { %v120_v7 = vld [vmem:[#allocation10] sm:$0xff]  ;;  %287 = vmatpush.msra.mxu3 %v239_v43 }
  0x1f   :  { %424 = vmatmul.msk.f32.vlgmr.msra.gmra.mxu0 %vm112_vm1, %v120_v7 }
  0x20   :  { %v238_v49 = vld [vmem:[#allocation11 + $0x8] sm:$0xff] }
  0x22   :  { %v236_v47 = vld [vmem:[#allocation10 + $0x8] sm:$0xff] }
  0x23   :  { %428 = vmatmul.msk.f32.vlgmr.msra.gmra.mxu2 %vm112_vm1, %v236_v47 }
  0x95   :  { %v176_v9 = vpop.f32.mrf.mxu1 }
  0x9c   :  { %v148_v11 = vpop.f32.mrf.mxu0 }
  0x9d   :  { %v177_v12 = vadd.f32 %v176_v9, %v148_v11 }
  0x9f   :  { %v183_v13 = vadd.f32 %v443_v10, %v177_v12 }
  0xa1   :  { %446 = vtanh.f32 %v183_v13  ;;  %v427_v16 = vmul.f32 -1.442695, %v183_v13 }
  0xa3   :  { %448 = vpow2.f32 %v427_v16  ;;  %v349_v16 = vld [vmem:[%s812_s9 + $0x8] sm:$0xff] }
  0xa6   :  { %v267_v51 = vpop.f32.mrf.mxu2 }
  0xa7   :  { %v447_v14 = vpop.eup %446 }
  0xa8   :  { %210 = vrot.lane.b32.xlu0 %v447_v14, %s622_s0  ;;  %v351_v14 = vld [vmem:[%s812_s9 + $0x18] sm:$0xff] }
  0xa9   :  { %v449_v17 = vpop.eup %448  ;;  %370 = vmatpush.msrb.mxu1 %v351_v14 }
  0xaa   :  { %v187_v18 = vadd.f32 1.0, %v449_v17  ;;  %v348_v17 = vld [vmem:[%s812_s9] sm:$0xff] }
  0xac   :  { %450 = vrcp.f32 %v187_v18  ;;  %v199_v24 = vand.u32 2147483648, %v187_v18  ;;  %vm193_vm4 = vweird.f32 %v187_v18  ;;  %v197_v25 = vand.u32 2147483647, %v187_v18 }
  0xae   :  { %v200_v27 = vor.u32 1.1754944e-38, %v199_v24  ;;  %vm198_vm6 = vcmp.eq.f32.partialorder %v197_v25, 8.507059e+37 }
  0xb0   :  { %205 = vrot.lane.b32.xlu0 %v121_v15, %s623_s14  ;;  %v350_v15 = vld [vmem:[%s812_s9 + $0x10] sm:$0xff]  ;;  %s626_s9 = smov [#allocation11]  }
  0xb1   :  { %371 = vmatpush.msrb.mxu1 %v350_v15  ;;  %s400_s15 = sshll.u32 %s626_s9, 4  ;;  %s401_s15 = int_to_ptr.vmem [resolvable:$true] %s400_s15 }
  0xb2   :  { %v451_v19 = vpop.eup %450 }
  0xb3   :  { %v189_v20 = vmul.f32 %v451_v19, %v187_v18  ;;  %vm194_vm3 = vweird.f32 %v451_v19  ;;  %372 = vmatpush.msrb.mxu1 %v349_v16 }
  0xb4   :  { %vm195_vm5 = vmor %vm193_vm4, %vm194_vm3 }
  0xb5   :  { %v190_v21 = vsub.f32 1.0, %v189_v20  ;;  %373 = vmatpush.msrb.mxu1 %v348_v17 }
  0xb7   :  { %v191_v22 = vmul.f32 %v451_v19, %v190_v21 }
  0xb8   :  { %318 = vrot.lane.b32.xlu0 %v238_v49, %s623_s14 }
  0xb9   :  { %v192_v23 = vadd.f32 %v451_v19, %v191_v22  ;;  %v445_v22 = vld [vmem:[%s813_s10] ss:$0 sm:$0xff] }
  0xbb   :  { %v196_v26 = vsel %vm195_vm5, %v451_v19, %v192_v23 }
  0xbc   :  { %v201_v29 = vsel %vm198_vm6, %v200_v27, %v196_v26 }
 0x11a   :  { %v211_v28 = vpop.permute.xlu0 %210 }
 0x11b   :  { %v213_v30 = vmul.f32 %v211_v28, %v201_v29 }
 0x11d   :  { %215 = vrot.lane.b32.xlu1 %v213_v30, %s623_s14 }
 0x122   :  { %v206_v31 = vpop.permute.xlu0 %205 }
 0x123   :  { %v208_v32 = vmul.f32 %v206_v31, %v201_v29 }
 0x12a   :  { %v319_v8 = vpop.permute.xlu0 %318 }
 0x18f   :  { %v216_v33 = vpop.permute.xlu1 %215 }
 0x190   :  { %v737_v34 = vadd.f32 %v216_v33, %v208_v32 }
 0x192   :  { %452 = vtanh.f32 %v737_v34 }
 0x198   :  { %v453_v35 = vpop.eup %452 }
 0x199   :  { %221 = vrot.lane.b32.xlu1 %v453_v35, %s622_s0 }
 0x20b   :  { %v222_v44 = vpop.permute.xlu1 %221 }
 0x20c   :  { %v224_v45 = vmul.f32 %v222_v44, %v201_v29 }
 0x20e   :  { %226 = vrot.lane.b32.xlu2 %v224_v45, %s623_s14 }
 0x268   :  { %v227_v50 = vpop.permute.xlu2 %226 }
 0x269   :  { %229 = vst.msk [vmem:[#allocation10] sm:$0xff] %vm112_vm1, %v227_v50  ;;  %429 = vmatmul.msk.f32.vlgmr.msra.gmra.mxu3 %vm112_vm1, %v227_v50 }
 0x2ec   :  { %v289_v53 = vpop.f32.mrf.mxu3 }
 0x2ed   :  { %v290_v54 = vadd.f32 %v289_v53, %v267_v51 }
 0x2ef   :  { %v296_v55 = vadd.f32 %v444_v52, %v290_v54 }
 0x2f1   :  { %454 = vtanh.f32 %v296_v55  ;;  %v430_v57 = vmul.f32 -1.442695, %v296_v55 }
 0x2f3   :  { %456 = vpow2.f32 %v430_v57 }
 0x2f7   :  { %v455_v56 = vpop.eup %454 }
 0x2f8   :  { %323 = vrot.lane.b32.xlu2 %v455_v56, %s622_s0 }
 0x2f9   :  { %v457_v58 = vpop.eup %456 }
 0x2fa   :  { %v300_v59 = vadd.f32 1.0, %v457_v58 }
 0x2fc   :  { %458 = vrcp.f32 %v300_v59  ;;  %v312_v1 = vand.u32 2147483648, %v300_v59  ;;  %vm306_vm8 = vweird.f32 %v300_v59  ;;  %v310_v2 = vand.u32 2147483647, %v300_v59 }
 0x2fe   :  { %v313_v4 = vor.u32 1.1754944e-38, %v312_v1  ;;  %vm311_vm10 = vcmp.eq.f32.partialorder %v310_v2, 8.507059e+37 }
 0x302   :  { %v459_v60 = vpop.eup %458 }
 0x303   :  { %v302_v61 = vmul.f32 %v459_v60, %v300_v59  ;;  %vm307_vm7 = vweird.f32 %v459_v60 }
 0x304   :  { %vm308_vm9 = vmor %vm306_vm8, %vm307_vm7 }
 0x305   :  { %v303_v62 = vsub.f32 1.0, %v302_v61 }
 0x307   :  { %v304_v63 = vmul.f32 %v459_v60, %v303_v62 }
 0x309   :  { %v305_v0 = vadd.f32 %v459_v60, %v304_v63 }
 0x30b   :  { %v309_v3 = vsel %vm308_vm9, %v459_v60, %v305_v0 }
 0x30c   :  { %v314_v5 = vsel %vm311_vm10, %v313_v4, %v309_v3 }
 0x30d   :  { %v321_v9 = vmul.f32 %v319_v8, %v314_v5 }
 0x352   :  { %v324_v6 = vpop.permute.xlu2 %323 }
 0x353   :  { %v326_v7 = vmul.f32 %v324_v6, %v314_v5 }
 0x355   :  { %328 = vrot.lane.b32.xlu1 %v326_v7, %s623_s14 }
 0x35d   :  { %231 = vrot.lane.b32.xlu1 %v737_v34, %s624_s8 }
 0x3c7   :  { %v329_v10 = vpop.permute.xlu1 %328 }
 0x3c8   :  { %v331_v11 = vadd.f32 %v329_v10, %v321_v9 }
 0x3ca   :  { %460 = vtanh.f32 %v331_v11 }
 0x3cf   :  { %v232_v12 = vpop.permute.xlu1 %231 }
 0x3d0   :  { %v461_v13 = vpop.eup %460  ;;  %234 = vst.msk [vmem:[#allocation11] sm:$0xff] %vm112_vm1, %v232_v12 }
 0x3d1   :  { %334 = vrot.lane.b32.xlu2 %v461_v13, %s622_s0 }
 0x3d9   :  { %344 = vrot.lane.b32.xlu2 %v331_v11, %s624_s8 }
 0x42b   :  { %v335_v18 = vpop.permute.xlu2 %334 }
 0x42c   :  { %v337_v19 = vmul.f32 %v335_v18, %v314_v5 }
 0x42e   :  { %339 = vrot.lane.b32.xlu0 %v337_v19, %s623_s14 }
 0x433   :  { %v345_v20 = vpop.permute.xlu2 %344 }
 0x434   :  { %347 = vst.msk [vmem:[#allocation11 + $0x8] sm:$0xff] %vm112_vm1, %v345_v20 }
 0x435   :  { %408 = dma.vmem_to_hbm [thread:$0]  %s401_s15, 256, %s403_s19, [#allocation12], %s617_s16, %s617_s16, %s618_s17  }
 0x4a0   :  { %v340_v21 = vpop.permute.xlu0 %339 }
 0x4a1   :  { %342 = vst.msk [vmem:[#allocation10 + $0x8] sm:$0xff] %vm112_vm1, %v340_v21  ;;  %431 = vmatmul.msk.f32.vlgmr.msrb.gmra.mxu1 %vm112_vm1, %v340_v21 }
 0x4a2   :  { %395 = dma.vmem_to_hbm [thread:$0]  %s388_s3, 256, %s390_s7, [#allocation4], %s617_s16, %s617_s16, %s618_s17  }
 0x51e   :  { %v375_v23 = vpop.f32.mrf.mxu1 }
 0x51f   :  { %v376_v24 = vadd.f32 %v445_v22, %v375_v23 }
 0x521   :  { %380 = vst.msk [vmem:[%s814_s11] sm:$0xff] %vm151_vm2, %v376_v24 }
 0x522   :  { %612 = dma.done.wait [#allocation4], 256  }
 0x523   :  { %613 = vsyncadd [#allocation4], 4294967040 }
 0x524   :  { %614 = dma.done.wait [#allocation12], 256  }
 0x525   :  { %615 = vsyncadd [#allocation12], 4294967040 }
 0x526   :  { %419 = vsyncpa [#allocation3], 1 }
 0x527   :  { %420 = vsyncpa [#allocation6], 1 }
 0x528   :  { %421 = vsyncpa [#allocation9], 1 }
 0x529   :  { %422 = vsyncpa [#allocation4], 1 }
 0x52a   :  { %423 = vsyncpa [#allocation12], 1 }

</bundles_post_ra>
